<compile_context>
chip_gen: v7x
topology: tpu7x:2x2x1
jax: 0.10.0
libtpu: 0.0.40
codegen_flags: <defaults>
</compile_context>

<pallas_src>
import jax
import jax.numpy as jnp
from jax.experimental import pallas as pl
from jax.experimental.pallas import tpu as pltpu


def _round_up(n, m):
    return ((n + m - 1) // m) * m


def _cdiv(a, b):
    return (a + b - 1) // b


def _mlp_kernel(x_ref, w1_ref, b1_ref, w2_ref, b2_ref, o_ref):
    # Fused Linear(20->256) + ReLU + Linear(256->10) on one batch tile.
    # All operands are unpadded; the (8,128) constraint is satisfied because every
    # small dim is the full array extent, and the MXU pads K=20 / N=10 in-vreg.
    x = x_ref[...]                                                     # (TM, 20)  f32
    h = jnp.dot(x, w1_ref[...], preferred_element_type=jnp.float32)   # (TM, 256) f32
    h = jnp.maximum(h + b1_ref[...], 0.0)                             # bias + ReLU (VPU, f32)
    y = jnp.dot(h, w2_ref[...], preferred_element_type=jnp.float32)   # (TM, 10)  f32
    o_ref[...] = (y + b2_ref[...]).astype(o_ref.dtype)


def my_sequential_forward(x, w1, b1, w2, b2, *, tm=None):
    """Fused forward of MySequential(Linear(20,256), ReLU(), Linear(256,10)).

    x : (batch, d_in) f32, w1 : (d_in, d_hidden), b1 : (1, d_hidden),
    w2 : (d_hidden, d_out), b2 : (1, d_out).
    Computes ReLU(x @ W1 + b1) @ W2 + b2 entirely inside one pallas_call.
    """
    batch, d_in = x.shape
    d_hidden = w1.shape[1]
    d_out = w2.shape[1]

    # Batch tile: big tiles amortize the ~0.35 us per-grid-step overhead; cap at half
    # the batch (min 8, multiple of 8 for f32 sublane alignment) so the grid has >= 2
    # steps whenever possible and v7x can shard the "parallel" axis over its 2 TCs.
    # Working set at tm=1024 is ~1.3 MiB -> far under every generation's VMEM limit.
    if tm is None:
        tm = min(1024, _round_up(max(_cdiv(batch, 2), 8), 8))
    batch_p = _round_up(batch, tm)
    grid = (batch_p // tm,)

    # Only the batch remainder (if any) is padded; no lane padding anywhere.
    if batch_p != batch:
        x_in = jnp.zeros((batch_p, d_in), x.dtype).at[:batch, :].set(x)
    else:
        x_in = x

    out = pl.pallas_call(
        _mlp_kernel,
        out_shape=jax.ShapeDtypeStruct((batch_p, d_out), jnp.float32),
        grid=grid,
        in_specs=[
            pl.BlockSpec((tm, d_in), lambda i: (i, 0)),         # X: tiled over batch, unpadded
            pl.BlockSpec((d_in, d_hidden), lambda i: (0, 0)),   # W1: VMEM-resident
            pl.BlockSpec((1, d_hidden), lambda i: (0, 0)),      # b1: VMEM-resident
            pl.BlockSpec((d_hidden, d_out), lambda i: (0, 0)),  # W2: VMEM-resident
            pl.BlockSpec((1, d_out), lambda i: (0, 0)),         # b2: VMEM-resident
        ],
        out_specs=pl.BlockSpec((tm, d_out), lambda i: (i, 0)),  # unpadded (TM, 10) output
        compiler_params=pltpu.CompilerParams(
            dimension_semantics=("parallel",),                  # shard batch tiles on v7x's 2 TCs
        ),
    )(x_in, w1, b1, w2, b2)

    if batch_p != batch:
        out = out[:batch]
    return out.astype(x.dtype)


def _init_linear(key, fan_in, fan_out, dtype=jnp.float32):
    # Deterministic init mimicking PyTorch's default (Kaiming-uniform-ish bounds).
    kw, kb = jax.random.split(key)
    bound = 1.0 / jnp.sqrt(fan_in)
    w = jax.random.uniform(kw, (fan_in, fan_out), dtype, -bound, bound)
    b = jax.random.uniform(kb, (1, fan_out), dtype, -bound, bound)
    return w, b


def reference_forward(x, w1, b1, w2, b2):
    hi = jax.lax.Precision.HIGHEST
    h = jnp.maximum(jnp.dot(x, w1, precision=hi) + b1, 0.0)
    return jnp.dot(h, w2, precision=hi) + b2


if __name__ == "__main__":
    key = jax.random.PRNGKey(0)
    k_x, k_l1, k_l2 = jax.random.split(key, 3)

    # Shapes of the canonical MySequential(Linear(20,256), ReLU(), Linear(256,10));
    # batch=256 -> tm=128 -> a 2-step "parallel" grid (exercises v7x TC sharding).
    batch, d_in, d_hidden, d_out = 256, 20, 256, 10
    x = jax.random.normal(k_x, (batch, d_in), jnp.float32)
    w1, b1 = _init_linear(k_l1, d_in, d_hidden)
    w2, b2 = _init_linear(k_l2, d_hidden, d_out)

    y = my_sequential_forward(x, w1, b1, w2, b2)
    y = jax.block_until_ready(y)

    y_ref = reference_forward(x, w1, b1, w2, b2)
    assert y.shape == (batch, d_out)
    # Kernel runs f32 accumulation; tolerance covers MXU multi-pass vs XLA f32 matmul.
    max_err = float(jnp.max(jnp.abs(y - y_ref)))
    assert jnp.allclose(y, y_ref, atol=2e-2, rtol=2e-2), (
        f"mismatch vs JAX reference (max abs err {max_err})")

    print("KERNEL_OK")
</pallas_src>

<mosaic_0001>
module attributes {stable_mosaic.version = 11 : i64} {
  func.func @_mlp_kernel(%arg0: i32, %arg1: memref<128x20xf32, #tpu.memory_space<vmem>>, %arg2: memref<20x256xf32, #tpu.memory_space<vmem>>, %arg3: memref<1x256xf32, #tpu.memory_space<vmem>>, %arg4: memref<256x10xf32, #tpu.memory_space<vmem>>, %arg5: memref<1x10xf32, #tpu.memory_space<vmem>>, %arg6: memref<128x10xf32, #tpu.memory_space<vmem>>) attributes {dimension_semantics = [#tpu.dimension_semantics<parallel>], iteration_bounds = array<i64: 2>, scalar_prefetch = 0 : i64, scratch_operands = 0 : i64, tpu.core_type = #tpu.core_type<tc>, window_params = [{transform_indices = @transform_0, window_bounds = array<i64: 128, 20>}, {pipeline_mode = #tpu.pipeline_mode<synchronous>, transform_indices = @transform_1, window_bounds = array<i64: 20, 256>}, {pipeline_mode = #tpu.pipeline_mode<synchronous>, transform_indices = @transform_2, window_bounds = array<i64: 1, 256>}, {pipeline_mode = #tpu.pipeline_mode<synchronous>, transform_indices = @transform_3, window_bounds = array<i64: 256, 10>}, {pipeline_mode = #tpu.pipeline_mode<synchronous>, transform_indices = @transform_4, window_bounds = array<i64: 1, 10>}, {transform_indices = @transform_5, window_bounds = array<i64: 128, 10>}]} {
    %c0 = arith.constant 0 : index
    %c0_0 = arith.constant 0 : index
    %0 = vector.load %arg1[%c0, %c0_0] : memref<128x20xf32, #tpu.memory_space<vmem>>, vector<128x20xf32>
    %c0_1 = arith.constant 0 : index
    %c0_2 = arith.constant 0 : index
    %1 = vector.load %arg2[%c0_1, %c0_2] : memref<20x256xf32, #tpu.memory_space<vmem>>, vector<20x256xf32>
    %cst = arith.constant dense<0.000000e+00> : vector<128x256xf32>
    %2 = tpu.matmul %0, %1, %cst {dimension_numbers = #tpu.dot_dimension_numbers<[1], [0], [0], [1], [0, 0, 1, 1], [], []>} : vector<128x20xf32>, vector<20x256xf32>, vector<128x256xf32> -> vector<128x256xf32>
    %c0_3 = arith.constant 0 : index
    %c0_4 = arith.constant 0 : index
    %3 = vector.load %arg3[%c0_3, %c0_4] : memref<1x256xf32, #tpu.memory_space<vmem>>, vector<1x256xf32>
    %4 = vector.broadcast %3 : vector<1x256xf32> to vector<128x256xf32>
    %5 = arith.addf %2, %4 : vector<128x256xf32>
    %cst_5 = arith.constant 0.000000e+00 : f32
    %6 = vector.broadcast %cst_5 : f32 to vector<128x256xf32>
    %7 = arith.maximumf %5, %6 : vector<128x256xf32>
    %c0_6 = arith.constant 0 : index
    %c0_7 = arith.constant 0 : index
    %8 = vector.load %arg4[%c0_6, %c0_7] : memref<256x10xf32, #tpu.memory_space<vmem>>, vector<256x10xf32>
    %cst_8 = arith.constant dense<0.000000e+00> : vector<128x10xf32>
    %9 = tpu.matmul %7, %8, %cst_8 {dimension_numbers = #tpu.dot_dimension_numbers<[1], [0], [0], [1], [0, 0, 1, 1], [], []>} : vector<128x256xf32>, vector<256x10xf32>, vector<128x10xf32> -> vector<128x10xf32>
    %c0_9 = arith.constant 0 : index
    %c0_10 = arith.constant 0 : index
    %10 = vector.load %arg5[%c0_9, %c0_10] : memref<1x10xf32, #tpu.memory_space<vmem>>, vector<1x10xf32>
    %11 = vector.broadcast %10 : vector<1x10xf32> to vector<128x10xf32>
    %12 = arith.addf %9, %11 : vector<128x10xf32>
    %c0_11 = arith.constant 0 : index
    %c0_12 = arith.constant 0 : index
    %13 = vector.load %arg6[%c0_11, %c0_12] : memref<128x10xf32, #tpu.memory_space<vmem>>, vector<128x10xf32>
    tpu.vector_store %arg6[%c0_11, %c0_12], %12 {strides = array<i32>} : memref<128x10xf32, #tpu.memory_space<vmem>>, vector<128x10xf32>,
    return
  }
  func.func @transform_0(%arg0: i32) -> (i32, i32) {
    %c0_i32 = arith.constant 0 : i32
    %c0_i32_0 = arith.constant 0 : i32
    return %arg0, %c0_i32 : i32, i32
  }
  func.func @transform_1(%arg0: i32) -> (i32, i32) {
    %c0_i32 = arith.constant 0 : i32
    %c0_i32_0 = arith.constant 0 : i32
    %c0_i32_1 = arith.constant 0 : i32
    return %c0_i32, %c0_i32_0 : i32, i32
  }
  func.func @transform_2(%arg0: i32) -> (i32, i32) {
    %c0_i32 = arith.constant 0 : i32
    %c0_i32_0 = arith.constant 0 : i32
    %c0_i32_1 = arith.constant 0 : i32
    return %c0_i32, %c0_i32_0 : i32, i32
  }
  func.func @transform_3(%arg0: i32) -> (i32, i32) {
    %c0_i32 = arith.constant 0 : i32
    %c0_i32_0 = arith.constant 0 : i32
    %c0_i32_1 = arith.constant 0 : i32
    return %c0_i32, %c0_i32_0 : i32, i32
  }
  func.func @transform_4(%arg0: i32) -> (i32, i32) {
    %c0_i32 = arith.constant 0 : i32
    %c0_i32_0 = arith.constant 0 : i32
    %c0_i32_1 = arith.constant 0 : i32
    return %c0_i32, %c0_i32_0 : i32, i32
  }
  func.func @transform_5(%arg0: i32) -> (i32, i32) {
    %c0_i32 = arith.constant 0 : i32
    %c0_i32_0 = arith.constant 0 : i32
    return %arg0, %c0_i32 : i32, i32
  }
}

</mosaic_0001>

<bundles_post_ra>
// kernel: tpu_custom_call.1
= control target key start
LH: loop header
LB: loop body
LE: loop exit
PB: predicated region body
PF: predicated region fallthrough
CT: control target
= control target key end

     0   :  { %s978_s18 = smov 0   ;;  %s1262_s0 = inlined_call_operand.vmem [shape: f32[256,20], index: 0, kind: input, shape index: {}]   ;;  %s1263_s1 = inlined_call_operand.vmem [shape: f32[20,256], index: 1, kind: input, shape index: {}]   ;;  %s1264_s2 = inlined_call_operand.vmem [shape: f32[1,256], index: 2, kind: input, shape index: {}]   ;;  %s1265_s3 = inlined_call_operand.vmem [shape: f32[256,10], index: 3, kind: input, shape index: {}]   ;;  %s1266_s4 = inlined_call_operand.vmem [shape: f32[1,10], index: 4, kind: input, shape index: {}]   ;;  %s1267_s5 = inlined_call_operand.vmem [shape: f32[256,10], index: 5, kind: output, shape index: {}]  }
   0x1 LB: > { %s768_s19 = sadd.s32 4294967295, %s945_s18   ;;  %p772_p0 = scmp.ge.s32.totalorder %s945_s18, 1  ;;  %s945_s18 = sphi %s978_s18, %s15_s18  }
   0x2   : > { %p188_p1 = scmp.lt.s32.totalorder %s945_s18, 3 }
   0x4   : > { %p189_p2 = pnand %p772_p0, %p188_p1 }
   0x5   : > { %v245_v0 = vld [vmem:[%s1263_s1 + $0x8] sm:$0xff] (!%p189_p2)  ;;  %v247_v1 = vld [vmem:[%s1263_s1 + $0x18] sm:$0xff] (!%p189_p2)  ;;  %v244_v2 = vld [vmem:[%s1263_s1] sm:$0xff] (!%p189_p2)  ;;  %s773_s26 = sshll.u32 (!%p189_p2), %s768_s19, 4  ;;  %v947_v6 = vmov (!%p189_p2), 0.0   ;;  %vm311_vm0 = vcmask (!%p189_p2), 1043456  }
   0x6   : > { %192 = sbr.rel (%p189_p2) target bundleno = 513 (0x201), region = 40  ;;  %v878_v3 = vpack.c.bf16 (!%p189_p2), %v247_v1, %v245_v0  ;;  %v246_v4 = vld [vmem:[%s1263_s1 + $0x10] sm:$0xff] (!%p189_p2)  ;;  %v249_v5 = vld [vmem:[%s1263_s1 + $0x28] sm:$0xf] (!%p189_p2)  ;;  %382 = vmatprep.mubr.f32.mxu0 (!%p189_p2), %v947_v6  ;;  %p217_p3 = scmp.lt.s32.totalorder (!%p189_p2), %s773_s26, 31  ;;  %v527_v8 = vld [vmem:[%s1265_s3 + $0x80] sm:$0xff] (!%p189_p2) }
   0x7   : > { %v880_v7 = vpack.c.bf16 (!%p189_p2), %v246_v4, %v244_v2  ;;  %v528_v9 = vld [vmem:[%s1265_s3 + $0x88] sm:$0xff] (!%p189_p2)  ;;  %v511_v10 = vld [vmem:[%s1265_s3] sm:$0xff] (!%p189_p2)  ;;  %v529_v13 = vld [vmem:[%s1265_s3 + $0x90] sm:$0xff] (!%p189_p2)  ;;  %vm262_vm1 = vcmask (!%p189_p2), 162816   ;;  %vm695_vm2 = vcmask (!%p189_p2), 80896  }
   0x8   : > { %879 = vmatprep.subr.bf16.mxu0 (!%p189_p2), %v878_v3  ;;  %v882_v11 = vpack.c.bf16 (!%p189_p2), %v528_v9, %v527_v8  ;;  %v512_v12 = vld [vmem:[%s1265_s3 + $0x8] sm:$0xff] (!%p189_p2)  ;;  %v530_v14 = vld [vmem:[%s1265_s3 + $0x98] sm:$0xff] (!%p189_p2)  ;;  %v248_v16 = vld [vmem:[%s1263_s1 + $0x20] sm:$0xf] (!%p189_p2)  ;;  %v252_v9 = vlaneseq (!%p189_p2) }
   0x9   : > { %881 = vmatpush1.bf16.msra.mxu0 (!%p189_p2), %v880_v7  ;;  %v884_v15 = vpack.c.bf16 (!%p189_p2), %v512_v12, %v511_v10  ;;  %v886_v17 = vpack.c.bf16 (!%p189_p2), %v530_v14, %v529_v13  ;;  %v513_v18 = vld [vmem:[%s1265_s3 + $0x10] sm:$0xff] (!%p189_p2)  ;;  %v514_v19 = vld [vmem:[%s1265_s3 + $0x18] sm:$0xff] (!%p189_p2)  ;;  %v531_v21 = vld [vmem:[%s1265_s3 + $0xa0] sm:$0xff] (!%p189_p2) }
   0xa   : > { %777 = vmatprep.subr.msk.mxu0 (!%p189_p2), %vm311_vm0, %v249_v5  ;;  %914 = vmatprep.subr.bf16.mxu1 (!%p189_p2), %v882_v11  ;;  %v532_v22 = vld [vmem:[%s1265_s3 + $0xa8] sm:$0xff] (!%p189_p2)  ;;  %v888_v23 = vpack.c.bf16 (!%p189_p2), %v514_v19, %v513_v18  ;;  %v515_v26 = vld [vmem:[%s1265_s3 + $0x20] sm:$0xff] (!%p189_p2)  ;;  %v533_v28 = vld [vmem:[%s1265_s3 + $0xb0] sm:$0xff] (!%p189_p2)  ;;  %v253_v10 = vshrl.u32 (!%p189_p2), %v252_v9, 7 }
   0xb   : > { %922 = vmatpush3.bf16.msra.mxu1 (!%p189_p2), %v884_v15  ;;  %v890_v25 = vpack.c.bf16 (!%p189_p2), %v532_v22, %v531_v21  ;;  %v516_v27 = vld [vmem:[%s1265_s3 + $0x28] sm:$0xff] (!%p189_p2)  ;;  %v534_v29 = vld [vmem:[%s1265_s3 + $0xb8] sm:$0xff] (!%p189_p2)  ;;  %v517_v33 = vld [vmem:[%s1265_s3 + $0x30] sm:$0xff] (!%p189_p2) }
   0xc   : > { %915 = vmatprep.subr.bf16.mxu1 (!%p189_p2), %v886_v17  ;;  %v892_v30 = vpack.c.bf16 (!%p189_p2), %v516_v27, %v515_v26  ;;  %v894_v32 = vpack.c.bf16 (!%p189_p2), %v534_v29, %v533_v28  ;;  %v518_v34 = vld [vmem:[%s1265_s3 + $0x38] sm:$0xff] (!%p189_p2)  ;;  %v535_v35 = vld [vmem:[%s1265_s3 + $0xc0] sm:$0xff] (!%p189_p2)  ;;  %v536_v36 = vld [vmem:[%s1265_s3 + $0xc8] sm:$0xff] (!%p189_p2)  ;;  %v258_v13 = vsub.s32 (!%p189_p2), 1, %v253_v10 }
   0xd   : > { %s1269_s26 = smov (!%p217_p3, %s773_s26), 31  ;;  %778 = vmatpush1.msk.msra.mxu0 %vm311_vm0, %v248_v16  ;;  %v896_v37 = vpack.c.bf16 %v518_v34, %v517_v33  ;;  %v898_v39 = vpack.c.bf16 %v536_v36, %v535_v35  ;;  %v519_v40 = vld [vmem:[%s1265_s3 + $0x40] sm:$0xff]  ;;  %v520_v41 = vld [vmem:[%s1265_s3 + $0x48] sm:$0xff]  ;;  %v537_v42 = vld [vmem:[%s1265_s3 + $0xd0] sm:$0xff] }
   0xe   : > { %s774_s21 = sshll.u32 %s1269_s26, 3  ;;  %883 = vmatprep.subr.bf16.mxu0 %v882_v11  ;;  %v538_v43 = vld [vmem:[%s1265_s3 + $0xd8] sm:$0xff]  ;;  %v900_v44 = vpack.c.bf16 %v520_v41, %v519_v40  ;;  %v521_v47 = vld [vmem:[%s1265_s3 + $0x50] sm:$0xff]  ;;  %v539_v49 = vld [vmem:[%s1265_s3 + $0xe0] sm:$0xff]  ;;  %v254_v11 = vsub.s32 0, %v253_v10 }
   0xf   : > { %s1032_s24 = scalar_lea.vmem %s1262_s0, %s774_s21  ;;  %923 = vmatpush3.bf16.msra.mxu1 %v888_v23  ;;  %v902_v46 = vpack.c.bf16 %v538_v43, %v537_v42  ;;  %v522_v48 = vld [vmem:[%s1265_s3 + $0x58] sm:$0xff]  ;;  %v540_v50 = vld [vmem:[%s1265_s3 + $0xe8] sm:$0xff]  ;;  %v523_v0 = vld [vmem:[%s1265_s3 + $0x60] sm:$0xff]  ;;  %s1209_s16 = scalar_lea.vmem %s1267_s5, %s774_s21 }
  0x10   : > { %v228_v20 = vld [vmem:[%s1032_s24] sm:$0xff]  ;;  %v229_v24 = vld [vmem:[%s1032_s24 + $0x8] sm:$0xff]  ;;  %916 = vmatprep.subr.bf16.mxu1 %v890_v25  ;;  %v230_v31 = vld [vmem:[%s1032_s24 + $0x10] sm:$0xff]  ;;  %v904_v51 = vpack.c.bf16 %v522_v48, %v521_v47  ;;  %v906_v53 = vpack.c.bf16 %v540_v50, %v539_v49 }
  0x11   : > { %779 = vmatmul.mubr.msk.f32.vlgmr.msra.gmra.mrb[0].mxu0 %vm262_vm1, %v228_v20  ;;  %v231_v38 = vld [vmem:[%s1032_s24 + $0x18] sm:$0xff]  ;;  %v232_v45 = vld [vmem:[%s1032_s24 + $0x20] sm:$0xff]  ;;  %v233_v52 = vld [vmem:[%s1032_s24 + $0x28] sm:$0xff] }
  0x12   : > { %388 = vmatprep.mubr.f32.mxu0 %v947_v6  ;;  %885 = vmatpush3.bf16.msra.mxu0 %v884_v15  ;;  %v234_v54 = vld [vmem:[%s1032_s24 + $0x30] sm:$0xff]  ;;  %v235_v55 = vld [vmem:[%s1032_s24 + $0x38] sm:$0xff]  ;;  %v236_v56 = vld [vmem:[%s1032_s24 + $0x40] sm:$0xff] }
  0x13   : > { %887 = vmatprep.subr.bf16.mxu0 %v886_v17  ;;  %924 = vmatpush3.bf16.msra.mxu1 %v892_v30  ;;  %v237_v57 = vld [vmem:[%s1032_s24 + $0x48] sm:$0xff]  ;;  %v238_v58 = vld [vmem:[%s1032_s24 + $0x50] sm:$0xff]  ;;  %v239_v59 = vld [vmem:[%s1032_s24 + $0x58] sm:$0xff] }
  0x14   : > { %917 = vmatprep.subr.bf16.mxu1 %v894_v32  ;;  %v240_v60 = vld [vmem:[%s1032_s24 + $0x60] sm:$0xff]  ;;  %v241_v61 = vld [vmem:[%s1032_s24 + $0x68] sm:$0xff]  ;;  %v242_v62 = vld [vmem:[%s1032_s24 + $0x70] sm:$0xff] }
  0x15   : > { %780 = vmatmul.mubr.msk.f32.gmra.mrb[2].mxu0 %vm262_vm1, %v229_v24  ;;  %v243_v63 = vld [vmem:[%s1032_s24 + $0x78] sm:$0xff]  ;;  %v524_v1 = vld [vmem:[%s1265_s3 + $0x68] sm:$0xff]  ;;  %v541_v3 = vld [vmem:[%s1265_s3 + $0xf0] sm:$0xff] }
  0x16   : > { %394 = vmatprep.mubr.f32.mxu0 %v947_v6  ;;  %889 = vmatpush3.bf16.msra.mxu0 %v888_v23  ;;  %v908_v2 = vpack.c.bf16 %v524_v1, %v523_v0  ;;  %v542_v4 = vld [vmem:[%s1265_s3 + $0xf8] sm:$0xff]  ;;  %v250_v12 = vld [vmem:[%s1264_s2] sm:$0x3] }
  0x17   : > { %891 = vmatprep.subr.bf16.mxu0 %v890_v25  ;;  %925 = vmatpush3.bf16.msra.mxu1 %v896_v37  ;;  %v910_v5 = vpack.c.bf16 %v542_v4, %v541_v3  ;;  %v526_v7 = vld [vmem:[%s1265_s3 + $0x78] sm:$0xff]  ;;  %v1163_v14 = vrot.slane %v250_v12, %v254_v11  ;;  %v1165_v15 = vrot.slane %v250_v12, %v258_v13 }
  0x18   : > { %918 = vmatprep.subr.bf16.mxu1 %v898_v39 }
  0x19   : > { %781 = vmatmul.mubr.msk.f32.gmra.mrb[4].mxu0 %vm262_vm1, %v230_v31 }
  0x1a   : > { %400 = vmatprep.mubr.f32.mxu0 %v947_v6  ;;  %893 = vmatpush3.bf16.msra.mxu0 %v892_v30 }
  0x1b   : > { %895 = vmatprep.subr.bf16.mxu0 %v894_v32  ;;  %926 = vmatpush3.bf16.msra.mxu1 %v900_v44 }
  0x1c   : > { %919 = vmatprep.subr.bf16.mxu1 %v902_v46 }
  0x1d   : > { %782 = vmatmul.mubr.msk.f32.gmra.mrb[6].mxu0 %vm262_vm1, %v231_v38 }
  0x1e   : > { %406 = vmatprep.mubr.f32.mxu0 %v947_v6  ;;  %897 = vmatpush3.bf16.msra.mxu0 %v896_v37 }
  0x1f   : > { %899 = vmatprep.subr.bf16.mxu0 %v898_v39  ;;  %927 = vmatpush3.bf16.msra.mxu1 %v904_v51 }
  0x20   : > { %920 = vmatprep.subr.bf16.mxu1 %v906_v53 }
  0x21   : > { %783 = vmatmul.mubr.msk.f32.gmra.mrb[8].mxu0 %vm262_vm1, %v232_v45 }
  0x22   : > { %412 = vmatprep.mubr.f32.mxu0 %v947_v6  ;;  %901 = vmatpush3.bf16.msra.mxu0 %v900_v44 }
  0x23   : > { %903 = vmatprep.subr.bf16.mxu0 %v902_v46  ;;  %928 = vmatpush3.bf16.msra.mxu1 %v908_v2 }
  0x24   : > { %921 = vmatprep.subr.bf16.mxu1 %v910_v5 }
  0x25   : > { %784 = vmatmul.mubr.msk.f32.gmra.mrb[10].mxu0 %vm262_vm1, %v233_v52 }
  0x26   : > { %418 = vmatprep.mubr.f32.mxu0 %v947_v6  ;;  %905 = vmatpush3.bf16.msra.mxu0 %v904_v51 }
  0x27   : > { %907 = vmatprep.subr.bf16.mxu0 %v906_v53 }
  0x29   : > { %785 = vmatmul.mubr.msk.f32.gmra.mrb[12].mxu0 %vm262_vm1, %v234_v54 }
  0x2a   : > { %424 = vmatprep.mubr.f32.mxu0 %v947_v6  ;;  %909 = vmatpush3.bf16.msra.mxu0 %v908_v2 }
  0x2b   : > { %911 = vmatprep.subr.bf16.mxu0 %v910_v5 }
  0x2d   : > { %786 = vmatmul.mubr.msk.f32.gmra.mrb[14].mxu0 %vm262_vm1, %v235_v55 }
  0x2e   : > { %430 = vmatprep.mubr.f32.mxu0 %v947_v6 }
  0x31   : > { %787 = vmatmul.mubr.msk.f32.gmra.mrb[16].mxu0 %vm262_vm1, %v236_v56 }
  0x32   : > { %436 = vmatprep.mubr.f32.mxu0 %v947_v6 }
  0x35   : > { %788 = vmatmul.mubr.msk.f32.gmra.mrb[18].mxu0 %vm262_vm1, %v237_v57 }
  0x36   : > { %442 = vmatprep.mubr.f32.mxu0 %v947_v6 }
  0x39   : > { %789 = vmatmul.mubr.msk.f32.gmra.mrb[20].mxu0 %vm262_vm1, %v238_v58 }
  0x3a   : > { %448 = vmatprep.mubr.f32.mxu0 %v947_v6 }
  0x3d   : > { %790 = vmatmul.mubr.msk.f32.gmra.mrb[22].mxu0 %vm262_vm1, %v239_v59 }
  0x3e   : > { %454 = vmatprep.mubr.f32.mxu0 %v947_v6 }
  0x41   : > { %791 = vmatmul.mubr.msk.f32.gmra.mrb[24].mxu0 %vm262_vm1, %v240_v60 }
  0x42   : > { %460 = vmatprep.mubr.f32.mxu0 %v947_v6 }
  0x45   : > { %792 = vmatmul.mubr.msk.f32.gmra.mrb[26].mxu0 %vm262_vm1, %v241_v61 }
  0x46   : > { %466 = vmatprep.mubr.f32.mxu0 %v947_v6 }
  0x49   : > { %793 = vmatmul.mubr.msk.f32.gmra.mrb[28].mxu0 %vm262_vm1, %v242_v62 }
  0x4a   : > { %472 = vmatprep.mubr.f32.mxu0 %v947_v6  ;;  %v525_v6 = vld [vmem:[%s1265_s3 + $0x70] sm:$0xff] }
  0x4b   : > { %v912_v8 = vpack.c.bf16 %v526_v7, %v525_v6 }
  0x4d   : > { %794 = vmatmul.mubr.msk.f32.gmra.mrb[30].mxu0 %vm262_vm1, %v243_v63  ;;  %929 = vmatpush3.bf16.msra.mxu1 %v912_v8 }
  0x4e   : > { %913 = vmatpush3.bf16.msra.mxu0 %v912_v8 }
  0xe4   : > { %v384_v16 = vpop.f32.mrb[0].mxu0 }
  0xe5   : > { %v385_v17 = vadd.f32 %v384_v16, %v1163_v14  ;;  %v386_v18 = vpop.f32.mrb[1].mxu0 }
  0xe6   : > { %v387_v19 = vadd.f32 %v386_v18, %v1165_v15 }
  0xe7   : > { %v479_v22 = vmax.f32 %v385_v17, 0.0 }
  0xe8   : > { %v480_v20 = vmax.f32 %v387_v19, 0.0  ;;  %v390_v21 = vpop.f32.mrb[2].mxu0 }
  0xe9   : > { %v391_v23 = vadd.f32 %v390_v21, %v1163_v14  ;;  %v392_v24 = vpop.f32.mrb[3].mxu0 }
  0xea   : > { %v393_v25 = vadd.f32 %v392_v24, %v1165_v15  ;;  %614 = vmatprep.mubr.f32.mxu0 %v480_v20 }
  0xeb   : > { %615 = vmatmul.mubr.f32.vlgmr.msra.gmra.mrb[32].mxu0 %v479_v22  ;;  %v481_v28 = vmax.f32 %v391_v23, 0.0 }
  0xec   : > { %v482_v26 = vmax.f32 %v393_v25, 0.0  ;;  %v396_v27 = vpop.f32.mrb[4].mxu0 }
  0xed   : > { %v397_v29 = vadd.f32 %v396_v27, %v1163_v14  ;;  %v398_v30 = vpop.f32.mrb[5].mxu0 }
  0xee   : > { %v399_v31 = vadd.f32 %v398_v30, %v1165_v15  ;;  %619 = vmatprep.mubr.f32.mxu0 %v482_v26 }
  0xef   : > { %620 = vmatmul.mubr.f32.gmra.mrb[34].mxu0 %v481_v28  ;;  %v483_v34 = vmax.f32 %v397_v29, 0.0 }
  0xf0   : > { %v484_v32 = vmax.f32 %v399_v31, 0.0  ;;  %v402_v33 = vpop.f32.mrb[6].mxu0 }
  0xf1   : > { %v403_v35 = vadd.f32 %v402_v33, %v1163_v14  ;;  %v404_v36 = vpop.f32.mrb[7].mxu0 }
  0xf2   : > { %624 = vmatprep.mubr.f32.mxu0 %v484_v32  ;;  %v405_v37 = vadd.f32 %v404_v36, %v1165_v15 }
  0xf3   : > { %625 = vmatmul.mubr.f32.gmra.mrb[36].mxu0 %v483_v34  ;;  %v485_v40 = vmax.f32 %v403_v35, 0.0 }
  0xf4   : > { %v408_v38 = vpop.f32.mrb[8].mxu0  ;;  %v486_v39 = vmax.f32 %v405_v37, 0.0 }
  0xf5   : > { %v409_v41 = vadd.f32 %v408_v38, %v1163_v14  ;;  %v410_v42 = vpop.f32.mrb[9].mxu0 }
  0xf6   : > { %v411_v43 = vadd.f32 %v410_v42, %v1165_v15  ;;  %629 = vmatprep.mubr.f32.mxu1 %v486_v39 }
  0xf7   : > { %630 = vmatmul.mubr.f32.vlgmr.msra.gmra.mrb[0].mxu1 %v485_v40  ;;  %v487_v46 = vmax.f32 %v409_v41, 0.0 }
  0xf8   : > { %v488_v44 = vmax.f32 %v411_v43, 0.0  ;;  %v414_v45 = vpop.f32.mrb[10].mxu0 }
  0xf9   : > { %v415_v47 = vadd.f32 %v414_v45, %v1163_v14  ;;  %v416_v48 = vpop.f32.mrb[11].mxu0 }
  0xfa   : > { %v417_v49 = vadd.f32 %v416_v48, %v1165_v15  ;;  %634 = vmatprep.mubr.f32.mxu1 %v488_v44 }
  0xfb   : > { %635 = vmatmul.mubr.f32.gmra.mrb[2].mxu1 %v487_v46  ;;  %v489_v52 = vmax.f32 %v415_v47, 0.0 }
  0xfc   : > { %v490_v50 = vmax.f32 %v417_v49, 0.0  ;;  %v420_v51 = vpop.f32.mrb[12].mxu0 }
  0xfd   : > { %v421_v53 = vadd.f32 %v420_v51, %v1163_v14  ;;  %v422_v54 = vpop.f32.mrb[13].mxu0  ;;  %v1202_v51 = vld [vmem:[%s1266_s4] ss:$0 sm:$0xff] }
  0xfe   : > { %v423_v55 = vadd.f32 %v422_v54, %v1165_v15  ;;  %639 = vmatprep.mubr.f32.mxu1 %v490_v50 }
  0xff   : > { %640 = vmatmul.mubr.f32.gmra.mrb[4].mxu1 %v489_v52  ;;  %v491_v58 = vmax.f32 %v421_v53, 0.0 }
 0x100   : > { %v492_v56 = vmax.f32 %v423_v55, 0.0  ;;  %v426_v57 = vpop.f32.mrb[14].mxu0 }
 0x101   : > { %v427_v59 = vadd.f32 %v426_v57, %v1163_v14  ;;  %v428_v60 = vpop.f32.mrb[15].mxu0 }
 0x102   : > { %v429_v61 = vadd.f32 %v428_v60, %v1165_v15  ;;  %644 = vmatprep.mubr.f32.mxu1 %v492_v56 }
 0x103   : > { %645 = vmatmul.mubr.f32.gmra.mrb[6].mxu1 %v491_v58  ;;  %v493_v0 = vmax.f32 %v427_v59, 0.0 }
 0x104   : > { %v494_v62 = vmax.f32 %v429_v61, 0.0  ;;  %v432_v63 = vpop.f32.mrb[16].mxu0 }
 0x105   : > { %v433_v1 = vadd.f32 %v432_v63, %v1163_v14  ;;  %v434_v2 = vpop.f32.mrb[17].mxu0 }
 0x106   : > { %v435_v3 = vadd.f32 %v434_v2, %v1165_v15  ;;  %649 = vmatprep.mubr.f32.mxu1 %v494_v62 }
 0x107   : > { %650 = vmatmul.mubr.f32.gmra.mrb[8].mxu1 %v493_v0  ;;  %v495_v6 = vmax.f32 %v433_v1, 0.0 }
 0x108   : > { %v496_v4 = vmax.f32 %v435_v3, 0.0  ;;  %v438_v5 = vpop.f32.mrb[18].mxu0 }
 0x109   : > { %v439_v7 = vadd.f32 %v438_v5, %v1163_v14  ;;  %v440_v8 = vpop.f32.mrb[19].mxu0 }
 0x10a   : > { %v441_v9 = vadd.f32 %v440_v8, %v1165_v15  ;;  %654 = vmatprep.mubr.f32.mxu1 %v496_v4 }
 0x10b   : > { %655 = vmatmul.mubr.f32.gmra.mrb[10].mxu1 %v495_v6  ;;  %v497_v12 = vmax.f32 %v439_v7, 0.0 }
 0x10c   : > { %v498_v10 = vmax.f32 %v441_v9, 0.0  ;;  %v444_v11 = vpop.f32.mrb[20].mxu0 }
 0x10d   : > { %v445_v13 = vadd.f32 %v444_v11, %v1163_v14  ;;  %v446_v16 = vpop.f32.mrb[21].mxu0 }
 0x10e   : > { %v447_v17 = vadd.f32 %v446_v16, %v1165_v15  ;;  %659 = vmatprep.mubr.f32.mxu1 %v498_v10 }
 0x10f   : > { %660 = vmatmul.mubr.f32.gmra.mrb[12].mxu1 %v497_v12  ;;  %v499_v20 = vmax.f32 %v445_v13, 0.0 }
 0x110   : > { %v500_v18 = vmax.f32 %v447_v17, 0.0  ;;  %v450_v19 = vpop.f32.mrb[22].mxu0 }
 0x111   : > { %v451_v21 = vadd.f32 %v450_v19, %v1163_v14  ;;  %v452_v22 = vpop.f32.mrb[23].mxu0 }
 0x112   : > { %v453_v23 = vadd.f32 %v452_v22, %v1165_v15  ;;  %664 = vmatprep.mubr.f32.mxu1 %v500_v18 }
 0x113   : > { %665 = vmatmul.mubr.f32.gmra.mrb[14].mxu1 %v499_v20  ;;  %v501_v26 = vmax.f32 %v451_v21, 0.0 }
 0x114   : > { %v502_v24 = vmax.f32 %v453_v23, 0.0  ;;  %v456_v25 = vpop.f32.mrb[24].mxu0 }
 0x115   : > { %v457_v27 = vadd.f32 %v456_v25, %v1163_v14  ;;  %v458_v28 = vpop.f32.mrb[25].mxu0 }
 0x116   : > { %v459_v29 = vadd.f32 %v458_v28, %v1165_v15  ;;  %669 = vmatprep.mubr.f32.mxu1 %v502_v24 }
 0x117   : > { %670 = vmatmul.mubr.f32.gmra.mrb[16].mxu1 %v501_v26  ;;  %v503_v32 = vmax.f32 %v457_v27, 0.0 }
 0x118   : > { %v504_v30 = vmax.f32 %v459_v29, 0.0  ;;  %v462_v31 = vpop.f32.mrb[26].mxu0 }
 0x119   : > { %v463_v33 = vadd.f32 %v462_v31, %v1163_v14  ;;  %v464_v34 = vpop.f32.mrb[27].mxu0 }
 0x11a   : > { %v465_v35 = vadd.f32 %v464_v34, %v1165_v15  ;;  %674 = vmatprep.mubr.f32.mxu1 %v504_v30 }
 0x11b   : > { %675 = vmatmul.mubr.f32.gmra.mrb[18].mxu1 %v503_v32  ;;  %v505_v38 = vmax.f32 %v463_v33, 0.0 }
 0x11c   : > { %v506_v36 = vmax.f32 %v465_v35, 0.0  ;;  %v468_v37 = vpop.f32.mrb[28].mxu0 }
 0x11d   : > { %v469_v39 = vadd.f32 %v468_v37, %v1163_v14  ;;  %v470_v40 = vpop.f32.mrb[29].mxu0 }
 0x11e   : > { %v471_v41 = vadd.f32 %v470_v40, %v1165_v15  ;;  %679 = vmatprep.mubr.f32.mxu1 %v506_v36 }
 0x11f   : > { %680 = vmatmul.mubr.f32.gmra.mrb[20].mxu1 %v505_v38  ;;  %v507_v44 = vmax.f32 %v469_v39, 0.0 }
 0x120   : > { %v508_v42 = vmax.f32 %v471_v41, 0.0  ;;  %v474_v43 = vpop.f32.mrb[30].mxu0 }
 0x121   : > { %v475_v45 = vadd.f32 %v474_v43, %v1163_v14  ;;  %v476_v46 = vpop.f32.mrb[31].mxu0 }
 0x122   : > { %v477_v47 = vadd.f32 %v476_v46, %v1165_v15  ;;  %684 = vmatprep.mubr.f32.mxu1 %v508_v42 }
 0x123   : > { %685 = vmatmul.mubr.f32.gmra.mrb[22].mxu1 %v507_v44  ;;  %v509_v49 = vmax.f32 %v475_v45, 0.0 }
 0x124   : > { %v510_v48 = vmax.f32 %v477_v47, 0.0 }
 0x126   : > { %689 = vmatprep.mubr.f32.mxu1 %v510_v48 }
 0x127   : > { %690 = vmatmul.mubr.f32.gmra.mrb[24].mxu1 %v509_v49 }
 0x1be   : > { %v830_v50 = vpop.f32.mrb[32].mxu0 }
 0x1bf   : > { %v831_v52 = vpop.f32.mrb[33].mxu0 }
 0x1c0   : > { %v832_v53 = vadd.f32 %v831_v52, %v830_v50 }
 0x1c2   : > { %v617_v14 = vadd.f32 %v832_v53, %v1202_v51  ;;  %v833_v15 = vpop.f32.mrb[34].mxu0 }
 0x1c3   : > { %v834_v54 = vpop.f32.mrb[35].mxu0 }
 0x1c4   : > { %696 = vst.msk [vmem:[%s1209_s16] sm:$0xff] %vm695_vm2, %v617_v14  ;;  %v835_v55 = vadd.f32 %v834_v54, %v833_v15 }
 0x1c6   : > { %v622_v56 = vadd.f32 %v835_v55, %v1202_v51  ;;  %v836_v57 = vpop.f32.mrb[36].mxu0 }
 0x1c7   : > { %v837_v58 = vpop.f32.mrb[37].mxu0 }
 0x1c8   : > { %697 = vst.msk [vmem:[%s1209_s16 + $0x8] sm:$0xff] %vm695_vm2, %v622_v56  ;;  %v838_v59 = vadd.f32 %v837_v58, %v836_v57 }
 0x1ca   : > { %v627_v60 = vadd.f32 %v838_v59, %v1202_v51  ;;  %v839_v61 = vpop.f32.mrb[0].mxu1 }
 0x1cb   : > { %v840_v62 = vpop.f32.mrb[1].mxu1 }
 0x1cc   : > { %698 = vst.msk [vmem:[%s1209_s16 + $0x10] sm:$0xff] %vm695_vm2, %v627_v60  ;;  %v841_v63 = vadd.f32 %v840_v62, %v839_v61 }
 0x1ce   : > { %v632_v0 = vadd.f32 %v841_v63, %v1202_v51  ;;  %v842_v1 = vpop.f32.mrb[2].mxu1 }
 0x1cf   : > { %v843_v2 = vpop.f32.mrb[3].mxu1 }
 0x1d0   : > { %699 = vst.msk [vmem:[%s1209_s16 + $0x18] sm:$0xff] %vm695_vm2, %v632_v0  ;;  %v844_v3 = vadd.f32 %v843_v2, %v842_v1 }
 0x1d2   : > { %v637_v4 = vadd.f32 %v844_v3, %v1202_v51  ;;  %v845_v5 = vpop.f32.mrb[4].mxu1 }
 0x1d3   : > { %v846_v6 = vpop.f32.mrb[5].mxu1 }
 0x1d4   : > { %700 = vst.msk [vmem:[%s1209_s16 + $0x20] sm:$0xff] %vm695_vm2, %v637_v4  ;;  %v847_v7 = vadd.f32 %v846_v6, %v845_v5 }
 0x1d6   : > { %v642_v8 = vadd.f32 %v847_v7, %v1202_v51  ;;  %v848_v9 = vpop.f32.mrb[6].mxu1 }
 0x1d7   : > { %v849_v10 = vpop.f32.mrb[7].mxu1 }
 0x1d8   : > { %701 = vst.msk [vmem:[%s1209_s16 + $0x28] sm:$0xff] %vm695_vm2, %v642_v8  ;;  %v850_v11 = vadd.f32 %v849_v10, %v848_v9 }
 0x1da   : > { %v647_v12 = vadd.f32 %v850_v11, %v1202_v51  ;;  %v851_v13 = vpop.f32.mrb[8].mxu1 }
 0x1db   : > { %v852_v16 = vpop.f32.mrb[9].mxu1 }
 0x1dc   : > { %702 = vst.msk [vmem:[%s1209_s16 + $0x30] sm:$0xff] %vm695_vm2, %v647_v12  ;;  %v853_v17 = vadd.f32 %v852_v16, %v851_v13 }
 0x1de   : > { %v652_v18 = vadd.f32 %v853_v17, %v1202_v51  ;;  %v854_v19 = vpop.f32.mrb[10].mxu1 }
 0x1df   : > { %v855_v20 = vpop.f32.mrb[11].mxu1 }
 0x1e0   : > { %703 = vst.msk [vmem:[%s1209_s16 + $0x38] sm:$0xff] %vm695_vm2, %v652_v18  ;;  %v856_v21 = vadd.f32 %v855_v20, %v854_v19 }
 0x1e2   : > { %v657_v22 = vadd.f32 %v856_v21, %v1202_v51  ;;  %v857_v23 = vpop.f32.mrb[12].mxu1 }
 0x1e3   : > { %v858_v24 = vpop.f32.mrb[13].mxu1 }
 0x1e4   : > { %704 = vst.msk [vmem:[%s1209_s16 + $0x40] sm:$0xff] %vm695_vm2, %v657_v22  ;;  %v859_v25 = vadd.f32 %v858_v24, %v857_v23 }
 0x1e6   : > { %v662_v26 = vadd.f32 %v859_v25, %v1202_v51  ;;  %v860_v27 = vpop.f32.mrb[14].mxu1 }
 0x1e7   : > { %v861_v28 = vpop.f32.mrb[15].mxu1 }
 0x1e8   : > { %705 = vst.msk [vmem:[%s1209_s16 + $0x48] sm:$0xff] %vm695_vm2, %v662_v26  ;;  %v862_v29 = vadd.f32 %v861_v28, %v860_v27 }
 0x1ea   : > { %v667_v30 = vadd.f32 %v862_v29, %v1202_v51  ;;  %v863_v31 = vpop.f32.mrb[16].mxu1 }
 0x1eb   : > { %v864_v32 = vpop.f32.mrb[17].mxu1 }
 0x1ec   : > { %706 = vst.msk [vmem:[%s1209_s16 + $0x50] sm:$0xff] %vm695_vm2, %v667_v30  ;;  %v865_v33 = vadd.f32 %v864_v32, %v863_v31 }
 0x1ee   : > { %v672_v34 = vadd.f32 %v865_v33, %v1202_v51  ;;  %v866_v35 = vpop.f32.mrb[18].mxu1 }
 0x1ef   : > { %v867_v36 = vpop.f32.mrb[19].mxu1 }
 0x1f0   : > { %707 = vst.msk [vmem:[%s1209_s16 + $0x58] sm:$0xff] %vm695_vm2, %v672_v34  ;;  %v868_v37 = vadd.f32 %v867_v36, %v866_v35 }
 0x1f2   : > { %v677_v38 = vadd.f32 %v868_v37, %v1202_v51  ;;  %v869_v39 = vpop.f32.mrb[20].mxu1 }
 0x1f3   : > { %v870_v40 = vpop.f32.mrb[21].mxu1 }
 0x1f4   : > { %708 = vst.msk [vmem:[%s1209_s16 + $0x60] sm:$0xff] %vm695_vm2, %v677_v38  ;;  %v871_v41 = vadd.f32 %v870_v40, %v869_v39 }
 0x1f6   : > { %v682_v42 = vadd.f32 %v871_v41, %v1202_v51  ;;  %v872_v43 = vpop.f32.mrb[22].mxu1 }
 0x1f7   : > { %v873_v44 = vpop.f32.mrb[23].mxu1 }
 0x1f8   : > { %709 = vst.msk [vmem:[%s1209_s16 + $0x68] sm:$0xff] %vm695_vm2, %v682_v42  ;;  %v874_v45 = vadd.f32 %v873_v44, %v872_v43 }
 0x1fa   : > { %v687_v46 = vadd.f32 %v874_v45, %v1202_v51  ;;  %v875_v47 = vpop.f32.mrb[24].mxu1 }
 0x1fb   : > { %v876_v48 = vpop.f32.mrb[25].mxu1 }
 0x1fc   : > { %710 = vst.msk [vmem:[%s1209_s16 + $0x70] sm:$0xff] %vm695_vm2, %v687_v46  ;;  %v877_v49 = vadd.f32 %v876_v48, %v875_v47 }
 0x1fe   : > { %v692_v50 = vadd.f32 %v877_v49, %v1202_v51 }
 0x200   : > { %711 = vst.msk [vmem:[%s1209_s16 + $0x78] sm:$0xff] %vm695_vm2, %v692_v50 }
 0x201 PF: > { %s15_s18 = sadd.s32 1, %s945_s18  }
 0x202   : > { %p12_p4 = scmp.ge.s32.totalorder %s15_s18, 4  }
 0x204   :  { %14 = sbr.rel (!%p12_p4) target bundleno = 1 (0x1), region = 70 }

</bundles_post_ra>
